<compile_context>
chip_gen: v7x
topology: tpu7x:2x2x1
jax: 0.10.0
libtpu: 0.0.40
codegen_flags: <defaults>
</compile_context>

<pallas_src>
import jax
import jax.numpy as jnp
from jax import lax
from jax.experimental import pallas as pl
from jax.experimental.pallas import tpu as pltpu


def _round_up(v, m):
    return (v + m - 1) // m * m


def _cdiv(a, b):
    return (a + b - 1) // b


def _vmem_capacity_bytes():
    """Physical VMEM per TensorCore; conservative fallback (v7x = 64 MiB)."""
    try:
        info = pltpu.get_tpu_info()
        cap = int(getattr(info, "vmem_capacity_bytes", 0) or 0)
        if cap > 0:
            return cap
    except Exception:
        pass
    return 64 << 20


# ----------------------------- kernels --------------------------------------


def _highway_resident_kernel(x_ref, w_ref, b_ref, o_ref):
    """Grid = (batch_tiles,).  All layers resident.
    w_ref: (L, S, 3S); b_ref: (L, 1, 3S).  Lane order = [gate | nonlin | lin]."""
    num_layers = w_ref.shape[0]
    s = x_ref.shape[1]
    x0 = x_ref[...].astype(jnp.float32)

    def body(layer, x):
        w = w_ref[layer]                               # (S, 3S), maybe bf16
        b = b_ref[layer].astype(jnp.float32)           # (1, 3S)
        y = jnp.dot(x.astype(w.dtype), w, preferred_element_type=jnp.float32) + b
        gate = jax.nn.sigmoid(y[:, 0 * s:1 * s])
        nonlinear = jax.nn.relu(y[:, 1 * s:2 * s])
        linear = y[:, 2 * s:3 * s]
        return linear + gate * (nonlinear - linear)

    x = lax.fori_loop(0, num_layers, body, x0, unroll=(num_layers <= 8))
    o_ref[...] = x.astype(o_ref.dtype)


def _make_streamed_kernel(use_scratch):
    """Grid = (batch_tiles, num_layers).  Weights streamed per layer,
    biases resident.  Carry lives in o_ref when the output is f32."""

    def kernel(x_ref, w_ref, b_ref, o_ref, *scratch):
        carry = scratch[0] if use_scratch else o_ref
        layer = pl.program_id(1)
        num_layers = pl.num_programs(1)
        s = x_ref.shape[1]

        @pl.when(layer == 0)
        def _():
            carry[...] = x_ref[...].astype(carry.dtype)

        x = carry[...].astype(jnp.float32)
        w = w_ref[0]                                    # (S, 3S)
        b = b_ref[layer].astype(jnp.float32)            # (1, 3S)
        y = jnp.dot(x.astype(w.dtype), w, preferred_element_type=jnp.float32) + b
        gate = jax.nn.sigmoid(y[:, 0 * s:1 * s])
        nonlinear = jax.nn.relu(y[:, 1 * s:2 * s])
        linear = y[:, 2 * s:3 * s]
        new_x = linear + gate * (nonlinear - linear)

        if use_scratch:
            carry[...] = new_x

            @pl.when(layer == num_layers - 1)
            def _():
                o_ref[...] = new_x.astype(o_ref.dtype)
        else:
            carry[...] = new_x.astype(carry.dtype)

    return kernel


# ----------------------------- wrapper ---------------------------------------


def highway_pallas(x, wn, bn, wl, bl, wg, bg, *,
                   matmul_dtype=jnp.bfloat16,
                   target_batch_tile=512,
                   force_streamed=False):
    """x: [B, S]; wn/wl/wg: [L, S, S] (x @ W layout); bn/bl/bg: [L, 1, S]."""
    B, S = x.shape
    L = wn.shape[0]

    s_pad = _round_up(S, 128)
    out_dtype = x.dtype
    w_dtype = jnp.dtype(matmul_dtype) if matmul_dtype is not None else jnp.dtype(wn.dtype)
    x_itemsize = jnp.dtype(x.dtype).itemsize
    o_itemsize = jnp.dtype(out_dtype).itemsize
    use_scratch = jnp.dtype(out_dtype) != jnp.dtype(jnp.float32)

    # ---- VMEM budgeting (v7x-safe: derive the ceiling from the hardware). ----
    vmem_cap = _vmem_capacity_bytes()
    vmem_ceiling = max(16 << 20, (vmem_cap * 7) // 8)
    headroom = 2 << 20

    bytes_w_layer = s_pad * 3 * s_pad * w_dtype.itemsize
    bytes_b_all = L * 3 * s_pad * 4
    # Per padded batch row: double-buffered x-in + o-out (+ f32 scratch carry).
    per_row = s_pad * (2 * x_itemsize + 2 * o_itemsize + (4 if use_scratch else 0))

    # Conservative 2x on the resident weight block (in case the pipeliner
    # double-buffers the grid-invariant block).
    resident_fixed = 2 * L * bytes_w_layer + 2 * bytes_b_all + headroom
    streamed_fixed = 2 * bytes_w_layer + 2 * bytes_b_all + headroom
    use_resident = (not force_streamed) and (resident_fixed + 128 * per_row <= vmem_ceiling)

    fixed = resident_fixed if use_resident else streamed_fixed
    tb_budget = max(8, (vmem_ceiling - fixed) // max(per_row, 1))
    tb_target = int(max(8, min(target_batch_tile, tb_budget)))

    # ---- Minimal-padding batch tiling; prefer >= 2 tiles (v7x megacore). ----
    n_tiles = max(1, _cdiv(B, tb_target))
    if n_tiles == 1 and B > 8:
        n_tiles = 2
    tb = _round_up(_cdiv(B, n_tiles), 8)
    n_tiles = _cdiv(B, tb)
    b_pad = n_tiles * tb

    # ---- Parameter prep: pad to lane/sublane-friendly shapes and fuse. ----
    def pad_w(w_part):  # [L, S, S] -> [L, s_pad, s_pad]
        return jnp.pad(w_part, ((0, 0), (0, s_pad - S), (0, s_pad - S)))

    def pad_b(b_part):  # [L, 1, S] -> [L, 1, s_pad]
        return jnp.pad(b_part, ((0, 0), (0, 0), (0, s_pad - S)))

    # Output-lane order = [gate | nonlinear | linear].
    w_fused = jnp.concatenate([pad_w(wg), pad_w(wn), pad_w(wl)], axis=-1)
    b_fused = jnp.concatenate([pad_b(bg), pad_b(bn), pad_b(bl)], axis=-1).astype(jnp.float32)
    if matmul_dtype is not None:
        w_fused = w_fused.astype(matmul_dtype)   # bias + gating math stay f32

    x_pad = jnp.pad(x, ((0, b_pad - B), (0, s_pad - S)))

    vmem_limit = int(min(max(fixed + tb * per_row + (1 << 20), 16 << 20), vmem_ceiling))

    # TODO(synk): optional int8 per-layer weight quantization for v5e/v6e
    # (not drop-in on v7x, which has no int MXU).

    if use_resident:
        out = pl.pallas_call(
            _highway_resident_kernel,
            out_shape=jax.ShapeDtypeStruct((b_pad, s_pad), out_dtype),
            grid_spec=pltpu.PrefetchScalarGridSpec(
                num_scalar_prefetch=0,
                grid=(n_tiles,),
                in_specs=[
                    pl.BlockSpec((tb, s_pad), lambda bi: (bi, 0)),              # x tile
                    pl.BlockSpec((L, s_pad, 3 * s_pad), lambda bi: (0, 0, 0)),  # all weights resident
                    pl.BlockSpec((L, 1, 3 * s_pad), lambda bi: (0, 0, 0)),      # all biases resident
                ],
                out_specs=pl.BlockSpec((tb, s_pad), lambda bi: (bi, 0)),
            ),
            compiler_params=pltpu.CompilerParams(
                dimension_semantics=("parallel",),
                vmem_limit_bytes=vmem_limit,
            ),
        )(x_pad, w_fused, b_fused)
    else:
        kernel = _make_streamed_kernel(use_scratch)
        scratch_shapes = [pltpu.VMEM((tb, s_pad), jnp.float32)] if use_scratch else []
        out = pl.pallas_call(
            kernel,
            out_shape=jax.ShapeDtypeStruct((b_pad, s_pad), out_dtype),
            grid_spec=pltpu.PrefetchScalarGridSpec(
                num_scalar_prefetch=0,
                grid=(n_tiles, L),
                in_specs=[
                    pl.BlockSpec((tb, s_pad), lambda bi, li: (bi, 0)),               # x tile (layer-invariant)
                    pl.BlockSpec((1, s_pad, 3 * s_pad), lambda bi, li: (li, 0, 0)),  # fused W, streamed per layer
                    pl.BlockSpec((L, 1, 3 * s_pad), lambda bi, li: (0, 0, 0)),       # all biases resident
                ],
                out_specs=pl.BlockSpec((tb, s_pad), lambda bi, li: (bi, 0)),
                scratch_shapes=scratch_shapes,
            ),
            compiler_params=pltpu.CompilerParams(
                dimension_semantics=("parallel", "arbitrary"),
                vmem_limit_bytes=vmem_limit,
            ),
        )(x_pad, w_fused, b_fused)

    return out[:B, :S]


def highway_ref(x, wn, bn, wl, bl, wg, bg):
    """Pure-JAX reference mirroring the PyTorch forward (f = ReLU)."""
    x = x.astype(jnp.float32)
    for layer in range(wn.shape[0]):
        gate = jax.nn.sigmoid(x @ wg[layer] + bg[layer])
        nonlinear = jax.nn.relu(x @ wn[layer] + bn[layer])
        linear = x @ wl[layer] + bl[layer]
        x = gate * nonlinear + (1.0 - gate) * linear
    return x


if __name__ == "__main__":
    batch = 4
    size = 32
    num_layers = 2

    key = jax.random.PRNGKey(0)
    keys = jax.random.split(key, 7)

    # Deterministic parameter init (uniform like nn.Linear default, bound = 1/sqrt(size)).
    bound = 1.0 / jnp.sqrt(jnp.float32(size))
    x = jax.random.normal(keys[0], (batch, size), dtype=jnp.float32)
    wn = jax.random.uniform(keys[1], (num_layers, size, size), jnp.float32, -bound, bound)
    wl = jax.random.uniform(keys[2], (num_layers, size, size), jnp.float32, -bound, bound)
    wg = jax.random.uniform(keys[3], (num_layers, size, size), jnp.float32, -bound, bound)
    bn = jax.random.uniform(keys[4], (num_layers, 1, size), jnp.float32, -bound, bound)
    bl = jax.random.uniform(keys[5], (num_layers, 1, size), jnp.float32, -bound, bound)
    bg = jax.random.uniform(keys[6], (num_layers, 1, size), jnp.float32, -bound, bound)

    expected = highway_ref(x, wn, bn, wl, bl, wg, bg)

    # Default path: resident weights, bf16 matmul (looser tolerance).
    out_default = jax.block_until_ready(highway_pallas(x, wn, bn, wl, bl, wg, bg))
    assert out_default.shape == (batch, size)
    assert jnp.allclose(out_default.astype(jnp.float32), expected, atol=5e-2, rtol=5e-2), \
        "default (resident, bf16) mismatch vs reference"

    # Resident path with f32 matmul: tight tolerance.
    out_f32 = jax.block_until_ready(
        highway_pallas(x, wn, bn, wl, bl, wg, bg, matmul_dtype=jnp.float32))
    assert jnp.allclose(out_f32, expected, atol=1e-5, rtol=1e-5), "f32 resident mismatch vs reference"

    # Streamed path (layer grid axis), f32 matmul, carry in o_ref: tight tolerance.
    out_str = jax.block_until_ready(
        highway_pallas(x, wn, bn, wl, bl, wg, bg, matmul_dtype=jnp.float32, force_streamed=True))
    assert jnp.allclose(out_str, expected, atol=1e-5, rtol=1e-5), "f32 streamed mismatch vs reference"

    # Streamed path with bf16 input (exercises the f32 scratch carry): loose tolerance.
    out_bf16 = jax.block_until_ready(
        highway_pallas(x.astype(jnp.bfloat16), wn, bn, wl, bl, wg, bg, force_streamed=True))
    assert out_bf16.dtype == jnp.bfloat16
    assert jnp.allclose(out_bf16.astype(jnp.float32), expected, atol=1e-1, rtol=1e-1), \
        "bf16 streamed mismatch vs reference"

    print("KERNEL_OK")
</pallas_src>

<mosaic_0001>
module attributes {stable_mosaic.version = 11 : i64} {
  func.func @_highway_resident_kernel(%arg0: i32, %arg1: memref<8x128xf32, #tpu.memory_space<vmem>>, %arg2: memref<2x128x384xbf16, #tpu.memory_space<vmem>>, %arg3: memref<2x1x384xf32, #tpu.memory_space<vmem>>, %arg4: memref<8x128xf32, #tpu.memory_space<vmem>>) attributes {dimension_semantics = [#tpu.dimension_semantics<parallel>], iteration_bounds = array<i64: 1>, scalar_prefetch = 0 : i64, scratch_operands = 0 : i64, tpu.core_type = #tpu.core_type<tc>, window_params = [{transform_indices = @transform_0, window_bounds = array<i64: 8, 128>}, {pipeline_mode = #tpu.pipeline_mode<synchronous>, transform_indices = @transform_1, window_bounds = array<i64: 2, 128, 384>}, {pipeline_mode = #tpu.pipeline_mode<synchronous>, transform_indices = @transform_2, window_bounds = array<i64: 2, 1, 384>}, {transform_indices = @transform_3, window_bounds = array<i64: 8, 128>}]} {
    %c0 = arith.constant 0 : index
    %c0_0 = arith.constant 0 : index
    %0 = vector.load %arg1[%c0, %c0_0] : memref<8x128xf32, #tpu.memory_space<vmem>>, vector<8x128xf32>
    %c0_i32 = arith.constant 0 : i32
    %1 = arith.index_cast %c0_i32 : i32 to index
    %c0_1 = arith.constant 0 : index
    %c0_2 = arith.constant 0 : index
    %2 = vector.load %arg2[%1, %c0_1, %c0_2] : memref<2x128x384xbf16, #tpu.memory_space<vmem>>, vector<1x128x384xbf16>
    %3 = vector.shape_cast %2 : vector<1x128x384xbf16> to vector<128x384xbf16>
    %4 = arith.index_cast %c0_i32 : i32 to index
    %c0_3 = arith.constant 0 : index
    %c0_4 = arith.constant 0 : index
    %5 = vector.load %arg3[%4, %c0_3, %c0_4] : memref<2x1x384xf32, #tpu.memory_space<vmem>>, vector<1x1x384xf32>
    %6 = vector.shape_cast %5 : vector<1x1x384xf32> to vector<1x384xf32>
    %7 = arith.truncf %0 : vector<8x128xf32> to vector<8x128xbf16>
    %cst = arith.constant dense<0.000000e+00> : vector<8x384xf32>
    %8 = tpu.matmul %7, %3, %cst {dimension_numbers = #tpu.dot_dimension_numbers<[1], [0], [0], [1], [0, 0, 1, 1], [], []>} : vector<8x128xbf16>, vector<128x384xbf16>, vector<8x384xf32> -> vector<8x384xf32>
    %9 = vector.broadcast %6 : vector<1x384xf32> to vector<8x384xf32>
    %10 = arith.addf %8, %9 : vector<8x384xf32>
    %11 = vector.extract_strided_slice %10 {offsets = [0, 0], sizes = [8, 128], strides = [1, 1]} : vector<8x384xf32> to vector<8x128xf32>
    %12 = arith.negf %11 : vector<8x128xf32>
    %13 = math.exp %12 : vector<8x128xf32>
    %cst_5 = arith.constant 1.000000e+00 : f32
    %14 = vector.broadcast %cst_5 : f32 to vector<8x128xf32>
    %15 = arith.addf %14, %13 : vector<8x128xf32>
    %16 = arith.divf %14, %15 : vector<8x128xf32>
    %17 = vector.extract_strided_slice %10 {offsets = [0, 128], sizes = [8, 128], strides = [1, 1]} : vector<8x384xf32> to vector<8x128xf32>
    %cst_6 = arith.constant 0.000000e+00 : f32
    %18 = vector.broadcast %cst_6 : f32 to vector<8x128xf32>
    %19 = arith.maximumf %17, %18 : vector<8x128xf32>
    %20 = vector.extract_strided_slice %10 {offsets = [0, 256], sizes = [8, 128], strides = [1, 1]} : vector<8x384xf32> to vector<8x128xf32>
    %21 = arith.subf %19, %20 : vector<8x128xf32>
    %22 = arith.mulf %16, %21 : vector<8x128xf32>
    %23 = arith.addf %20, %22 : vector<8x128xf32>
    %c1_i32 = arith.constant 1 : i32
    %24 = arith.index_cast %c1_i32 : i32 to index
    %c0_7 = arith.constant 0 : index
    %c0_8 = arith.constant 0 : index
    %25 = vector.load %arg2[%24, %c0_7, %c0_8] : memref<2x128x384xbf16, #tpu.memory_space<vmem>>, vector<1x128x384xbf16>
    %26 = vector.shape_cast %25 : vector<1x128x384xbf16> to vector<128x384xbf16>
    %27 = arith.index_cast %c1_i32 : i32 to index
    %c0_9 = arith.constant 0 : index
    %c0_10 = arith.constant 0 : index
    %28 = vector.load %arg3[%27, %c0_9, %c0_10] : memref<2x1x384xf32, #tpu.memory_space<vmem>>, vector<1x1x384xf32>
    %29 = vector.shape_cast %28 : vector<1x1x384xf32> to vector<1x384xf32>
    %30 = arith.truncf %23 : vector<8x128xf32> to vector<8x128xbf16>
    %cst_11 = arith.constant dense<0.000000e+00> : vector<8x384xf32>
    %31 = tpu.matmul %30, %26, %cst_11 {dimension_numbers = #tpu.dot_dimension_numbers<[1], [0], [0], [1], [0, 0, 1, 1], [], []>} : vector<8x128xbf16>, vector<128x384xbf16>, vector<8x384xf32> -> vector<8x384xf32>
    %32 = vector.broadcast %29 : vector<1x384xf32> to vector<8x384xf32>
    %33 = arith.addf %31, %32 : vector<8x384xf32>
    %34 = vector.extract_strided_slice %33 {offsets = [0, 0], sizes = [8, 128], strides = [1, 1]} : vector<8x384xf32> to vector<8x128xf32>
    %35 = arith.negf %34 : vector<8x128xf32>
    %36 = math.exp %35 : vector<8x128xf32>
    %cst_12 = arith.constant 1.000000e+00 : f32
    %37 = vector.broadcast %cst_12 : f32 to vector<8x128xf32>
    %38 = arith.addf %37, %36 : vector<8x128xf32>
    %39 = arith.divf %37, %38 : vector<8x128xf32>
    %40 = vector.extract_strided_slice %33 {offsets = [0, 128], sizes = [8, 128], strides = [1, 1]} : vector<8x384xf32> to vector<8x128xf32>
    %cst_13 = arith.constant 0.000000e+00 : f32
    %41 = vector.broadcast %cst_13 : f32 to vector<8x128xf32>
    %42 = arith.maximumf %40, %41 : vector<8x128xf32>
    %43 = vector.extract_strided_slice %33 {offsets = [0, 256], sizes = [8, 128], strides = [1, 1]} : vector<8x384xf32> to vector<8x128xf32>
    %44 = arith.subf %42, %43 : vector<8x128xf32>
    %45 = arith.mulf %39, %44 : vector<8x128xf32>
    %46 = arith.addf %43, %45 : vector<8x128xf32>
    %c2_i32 = arith.constant 2 : i32
    %c0_14 = arith.constant 0 : index
    %c0_15 = arith.constant 0 : index
    %47 = vector.load %arg4[%c0_14, %c0_15] : memref<8x128xf32, #tpu.memory_space<vmem>>, vector<8x128xf32>
    tpu.vector_store %arg4[%c0_14, %c0_15], %46 {strides = array<i32>} : memref<8x128xf32, #tpu.memory_space<vmem>>, vector<8x128xf32>,
    return
  }
  func.func @transform_0(%arg0: i32) -> (i32, i32) {
    %c0_i32 = arith.constant 0 : i32
    %c0_i32_0 = arith.constant 0 : i32
    return %arg0, %c0_i32 : i32, i32
  }
  func.func @transform_1(%arg0: i32) -> (i32, i32, i32) {
    %c0_i32 = arith.constant 0 : i32
    %c0_i32_0 = arith.constant 0 : i32
    %c0_i32_1 = arith.constant 0 : i32
    %c0_i32_2 = arith.constant 0 : i32
    return %c0_i32, %c0_i32_0, %c0_i32_1 : i32, i32, i32
  }
  func.func @transform_2(%arg0: i32) -> (i32, i32, i32) {
    %c0_i32 = arith.constant 0 : i32
    %c0_i32_0 = arith.constant 0 : i32
    %c0_i32_1 = arith.constant 0 : i32
    %c0_i32_2 = arith.constant 0 : i32
    return %c0_i32, %c0_i32_0, %c0_i32_1 : i32, i32, i32
  }
  func.func @transform_3(%arg0: i32) -> (i32, i32) {
    %c0_i32 = arith.constant 0 : i32
    %c0_i32_0 = arith.constant 0 : i32
    return %arg0, %c0_i32 : i32, i32
  }
}

</mosaic_0001>

<bundles_post_ra>
// kernel: tpu_custom_call.1
= control target key start
LH: loop header
LB: loop body
LE: loop exit
PB: predicated region body
PF: predicated region fallthrough
CT: control target
= control target key end

     0   :  { %8 = vsyncpa [#allocation3], 0  ;;  %s958_s0 = inlined_call_operand.hbm [shape: f32[8,128], index: 0, kind: input, shape index: {}]   ;;  %s959_s1 = inlined_call_operand.hbm [shape: bf16[2,128,384], index: 1, kind: input, shape index: {}]   ;;  %s960_s2 = inlined_call_operand.vmem [shape: f32[2,1,384], index: 2, kind: input, shape index: {}]   ;;  %s961_s3 = inlined_call_operand.hbm [shape: f32[8,128], index: 3, kind: output, shape index: {}]  }
   0x1   :  { %9 = vsyncpa [#allocation6], 0 }
   0x2   :  { %10 = vsyncpa [#allocation4], 0  ;;  %s861_s12 = smov [#allocation2]   ;;  %s862_s14 = smov [#allocation5]  }
   0x3   :  { %s17_s13 = sshll.u32 %s861_s12, 4  ;;  %s26_s15 = sshll.u32 %s862_s14, 4  ;;  %s18_s13 = int_to_ptr.vmem [resolvable:$true] %s17_s13  ;;  %s889_s15 = int_to_ptr.vmem [resolvable:$true] %s26_s15 }
   0x4   :  { %s789_s18 = scalar_lea.hbm %s958_s0, 128 }
   0x5   :  { %p790_p0 = scmp.ne.s32.totalorder %s958_s0, %s789_s18  ;;  %p793_p1 = scmp.lt.u32.totalorder %s789_s18, %s958_s0 }
   0x7   :  { %p795_p2 = pnand %p793_p1, %p790_p0 }
   0x9   :  { %798 = shalt.err (!%p795_p2)
}
   0xa   :  { %s799_s23 = scalar_lea.vmem %s18_s13, 128  ;;  %p804_p4 = scmp.lt.s32.totalorder %s18_s13, %s18_s13 }
   0xb   :  { %p800_p3 = scmp.ne.s32.totalorder %s18_s13, %s799_s23  ;;  %p805_p5 = scmp.lt.s32.totalorder %s799_s23, %s799_s23 }
   0xd   :  { %p806_p6 = por %p805_p5, %p804_p4 }
   0xf   :  { %p807_p7 = pnand %p806_p6, %p800_p3 }
  0x11   :  { %810 = shalt.err (!%p807_p7)
}
  0x12   :  { %20 = dma.hbm_to_vmem [thread:$0]  %s958_s0, 128, %s18_s13, [#allocation3]  }
  0x13   :  { %s811_s28 = scalar_lea.hbm %s959_s1, 6144 }
  0x14   :  { %p812_p8 = scmp.ne.s32.totalorder %s959_s1, %s811_s28  ;;  %p815_p9 = scmp.lt.u32.totalorder %s811_s28, %s959_s1 }
  0x16   :  { %p817_p10 = pnand %p815_p9, %p812_p8 }
  0x18   :  { %820 = shalt.err (!%p817_p10)
}
  0x19   :  { %s821_s6 = scalar_lea.vmem %s889_s15, 6144  ;;  %p826_p12 = scmp.lt.s32.totalorder %s889_s15, %s889_s15 }
  0x1a   :  { %p822_p11 = scmp.ne.s32.totalorder %s889_s15, %s821_s6  ;;  %p827_p13 = scmp.lt.s32.totalorder %s821_s6, %s821_s6 }
  0x1c   :  { %p828_p0 = por %p827_p13, %p826_p12 }
  0x1e   :  { %p829_p1 = pnand %p828_p0, %p822_p11 }
  0x20   :  { %832 = shalt.err (!%p829_p1)
}
  0x21   :  { %s863_s0 = smov 192   ;;  %s864_s7 = smov 12  }
  0x22   :  { %32 = dma.hbm_to_vmem [thread:$0]  %s959_s1, 6144, %s889_s15, [#allocation6], %s863_s0, %s863_s0, %s864_s7  }
  0x23   :  { %855 = dma.done.wait [#allocation3], 128  }
  0x24   :  { %856 = vsyncadd [#allocation3], 4294967168 }
  0x25   :  { %857 = dma.done.wait [#allocation6], 6144  }
  0x26   :  { %858 = vsyncadd [#allocation6], 4294961152  ;;  %v865_v0 = vmov 0.0   ;;  %v866_v1 = vmov 0   ;;  %vm867_vm0 = vmmov 0   ;;  %v42_v25 = vld [vmem:[#allocation2] sm:$0xff]  ;;  %v78_v52 = vlaneseq }
  0x27   :  { %669 = vmatprep.subr.bf16.mxu1 %v865_v0  ;;  %253 = vmatprep.mubr.bf16.mxu0 %v866_v1  ;;  %v717_v2 = vld [vmem:[#allocation5 + $0x4] ss:$12 sps:$4 sm:$0xff]   ;;  %v719_v3 = vld [vmem:[#allocation5] ss:$12 sps:$4 sm:$0xff]   ;;  %v720_v4 = vld [vmem:[#allocation5 + $0x1c] ss:$12 sps:$4 sm:$0xff]   ;;  %v76_v27 = vpack.c.bf16 %v42_v25, %v42_v25 }
  0x28   :  { %685 = vmatprep.mubr.msk.bf16.mxu1 %vm867_vm0, %v865_v0  ;;  %221 = vmatprep.subr.bf16.mxu0 %v717_v2  ;;  %v722_v5 = vld [vmem:[#allocation5 + $0x8] ss:$12 sps:$4 sm:$0xff]   ;;  %v723_v6 = vld [vmem:[#allocation5 + $0x18] ss:$12 sps:$4 sm:$0xff]   ;;  %v726_v8 = vld [vmem:[#allocation5 + $0x20] ss:$12 sps:$4 sm:$0xff]  }
  0x29   :  { %222 = vmatpush1.bf16.msra.mxu0 %v719_v3  ;;  %v724_v7 = vld [vmem:[#allocation5 + $0x34] ss:$12 sps:$4 sm:$0xff]   ;;  %670 = vmatpush3.bf16.msra.mxu1 %v722_v5  ;;  %v727_v9 = vld [vmem:[#allocation5 + $0x30] ss:$12 sps:$4 sm:$0xff]   ;;  %v728_v10 = vld [vmem:[#allocation5 + $0x4c] ss:$12 sps:$4 sm:$0xff]  }
  0x2a   :  { %223 = vmatprep.subr.bf16.mxu0 %v720_v4  ;;  %671 = vmatprep.subr.bf16.mxu1 %v865_v0  ;;  %v730_v11 = vld [vmem:[#allocation5 + $0x38] ss:$12 sps:$4 sm:$0xff]   ;;  %v731_v12 = vld [vmem:[#allocation5 + $0x48] ss:$12 sps:$4 sm:$0xff]   ;;  %v734_v14 = vld [vmem:[#allocation5 + $0x50] ss:$12 sps:$4 sm:$0xff]  }
  0x2b   :  { %v732_v13 = vld [vmem:[#allocation5 + $0x64] ss:$12 sps:$4 sm:$0xff]   ;;  %v735_v15 = vld [vmem:[#allocation5 + $0x60] ss:$12 sps:$4 sm:$0xff]   ;;  %v736_v16 = vld [vmem:[#allocation5 + $0x7c] ss:$12 sps:$4 sm:$0xff]  }
  0x2c   :  { %v738_v17 = vld [vmem:[#allocation5 + $0x68] ss:$12 sps:$4 sm:$0xff]   ;;  %v739_v18 = vld [vmem:[#allocation5 + $0x78] ss:$12 sps:$4 sm:$0xff]   ;;  %v742_v20 = vld [vmem:[#allocation5 + $0x80] ss:$12 sps:$4 sm:$0xff]  }
  0x2d   :  { %224 = vmatpush1.bf16.msra.mxu0 %v723_v6  ;;  %672 = vmatpush3.bf16.msra.mxu1 %v726_v8  ;;  %v740_v19 = vld [vmem:[#allocation5 + $0x94] ss:$12 sps:$4 sm:$0xff]   ;;  %v743_v21 = vld [vmem:[#allocation5 + $0x90] ss:$12 sps:$4 sm:$0xff]   ;;  %v744_v22 = vld [vmem:[#allocation5 + $0xac] ss:$12 sps:$4 sm:$0xff]  }
  0x2e   :  { %225 = vmatprep.subr.bf16.mxu0 %v724_v7  ;;  %673 = vmatprep.subr.bf16.mxu1 %v865_v0  ;;  %v746_v23 = vld [vmem:[#allocation5 + $0x98] ss:$12 sps:$4 sm:$0xff]   ;;  %v747_v24 = vld [vmem:[#allocation5 + $0xa8] ss:$12 sps:$4 sm:$0xff]   ;;  %v748_v26 = vld [vmem:[#allocation5 + $0xb0] ss:$12 sps:$4 sm:$0xff]  }
  0x2f   :  { %v751_v28 = vld [vmem:[#allocation5 + $0xc4] ss:$12 sps:$4 sm:$0xff]   ;;  %v749_v29 = vld [vmem:[#allocation5 + $0xc0] ss:$12 sps:$4 sm:$0xff]   ;;  %v752_v30 = vld [vmem:[#allocation5 + $0xc8] ss:$12 sps:$4 sm:$0xff]  }
  0x30   :  { %v755_v31 = vld [vmem:[#allocation5 + $0xdc] ss:$12 sps:$4 sm:$0xff]   ;;  %v753_v32 = vld [vmem:[#allocation5 + $0xd8] ss:$12 sps:$4 sm:$0xff]   ;;  %v756_v33 = vld [vmem:[#allocation5 + $0xe0] ss:$12 sps:$4 sm:$0xff]  }
  0x31   :  { %226 = vmatpush1.bf16.msra.mxu0 %v727_v9  ;;  %674 = vmatpush3.bf16.msra.mxu1 %v730_v11  ;;  %v759_v34 = vld [vmem:[#allocation5 + $0xf4] ss:$12 sps:$4 sm:$0xff]   ;;  %v757_v35 = vld [vmem:[#allocation5 + $0xf0] ss:$12 sps:$4 sm:$0xff]   ;;  %v760_v36 = vld [vmem:[#allocation5 + $0xf8] ss:$12 sps:$4 sm:$0xff]  }
  0x32   :  { %227 = vmatprep.subr.bf16.mxu0 %v728_v10  ;;  %675 = vmatprep.subr.bf16.mxu1 %v865_v0  ;;  %v763_v37 = vld [vmem:[#allocation5 + $0x10c] ss:$12 sps:$4 sm:$0xff]   ;;  %v761_v38 = vld [vmem:[#allocation5 + $0x108] ss:$12 sps:$4 sm:$0xff]   ;;  %v764_v39 = vld [vmem:[#allocation5 + $0x110] ss:$12 sps:$4 sm:$0xff]  }
  0x33   :  { %v767_v40 = vld [vmem:[#allocation5 + $0x124] ss:$12 sps:$4 sm:$0xff]   ;;  %v765_v41 = vld [vmem:[#allocation5 + $0x120] ss:$12 sps:$4 sm:$0xff]   ;;  %v768_v42 = vld [vmem:[#allocation5 + $0x128] ss:$12 sps:$4 sm:$0xff]  }
  0x34   :  { %v771_v43 = vld [vmem:[#allocation5 + $0x13c] ss:$12 sps:$4 sm:$0xff]   ;;  %v769_v44 = vld [vmem:[#allocation5 + $0x138] ss:$12 sps:$4 sm:$0xff]   ;;  %v772_v45 = vld [vmem:[#allocation5 + $0x140] ss:$12 sps:$4 sm:$0xff]  }
  0x35   :  { %228 = vmatpush1.bf16.msra.mxu0 %v731_v12  ;;  %676 = vmatpush3.bf16.msra.mxu1 %v734_v14  ;;  %v775_v46 = vld [vmem:[#allocation5 + $0x154] ss:$12 sps:$4 sm:$0xff]   ;;  %v773_v47 = vld [vmem:[#allocation5 + $0x150] ss:$12 sps:$4 sm:$0xff]   ;;  %v776_v48 = vld [vmem:[#allocation5 + $0x158] ss:$12 sps:$4 sm:$0xff]  }
  0x36   :  { %229 = vmatprep.subr.bf16.mxu0 %v732_v13  ;;  %677 = vmatprep.subr.bf16.mxu1 %v865_v0  ;;  %v779_v49 = vld [vmem:[#allocation5 + $0x16c] ss:$12 sps:$4 sm:$0xff]   ;;  %v777_v50 = vld [vmem:[#allocation5 + $0x168] ss:$12 sps:$4 sm:$0xff]   ;;  %v780_v51 = vld [vmem:[#allocation5 + $0x170] ss:$12 sps:$4 sm:$0xff]  }
  0x37   :  { %v79_v53 = vshrl.u32 %v78_v52, 7  ;;  %v75_v55 = vld [vmem:[%s960_s2] sm:$0x7] }
  0x39   :  { %230 = vmatpush1.bf16.msra.mxu0 %v735_v15  ;;  %678 = vmatpush3.bf16.msra.mxu1 %v738_v17  ;;  %v80_v54 = vsub.s32 0, %v79_v53  ;;  %v84_v56 = vsub.s32 1, %v79_v53  ;;  %v88_v57 = vsub.s32 2, %v79_v53  ;;  %v625_v17 = vld [vmem:[%s960_s2 + $0x3] sm:$0x7]  ;;  %s868_s2 = smov [#allocation7]  }
  0x3a   :  { %231 = vmatprep.subr.bf16.mxu0 %v736_v16  ;;  %679 = vmatprep.subr.bf16.mxu1 %v865_v0  ;;  %s590_s13 = sshll.u32 %s868_s2, 4  ;;  %s591_s13 = int_to_ptr.vmem [resolvable:$true] %s590_s13 }
  0x3b   :  { %v81_v58 = vrot.slane %v75_v55, %v80_v54  ;;  %v85_v59 = vrot.slane %v75_v55, %v84_v56  ;;  %v89_v60 = vrot.slane %v75_v55, %v88_v57  ;;  %s833_s14 = scalar_lea.vmem %s591_s13, 128  ;;  %p838_p3 = scmp.lt.s32.totalorder %s591_s13, %s591_s13 }
  0x3c   :  { %p834_p2 = scmp.ne.s32.totalorder %s591_s13, %s833_s14  ;;  %p839_p4 = scmp.lt.s32.totalorder %s833_s14, %s833_s14 }
  0x3d   :  { %232 = vmatpush1.bf16.msra.mxu0 %v739_v18  ;;  %680 = vmatpush3.bf16.msra.mxu1 %v742_v20  ;;  %v352_v18 = vrot.slane %v625_v17, %v80_v54 }
  0x3e   :  { %233 = vmatprep.subr.bf16.mxu0 %v740_v19  ;;  %681 = vmatprep.subr.bf16.mxu1 %v865_v0  ;;  %v356_v19 = vrot.slane %v625_v17, %v84_v56  ;;  %p840_p5 = por %p839_p4, %p838_p3 }
  0x40   :  { %p841_p6 = pnand %p840_p5, %p834_p2 }
  0x41   :  { %234 = vmatpush1.bf16.msra.mxu0 %v743_v21  ;;  %682 = vmatpush3.bf16.msra.mxu1 %v746_v23  ;;  %v360_v21 = vrot.slane %v625_v17, %v88_v57 }
  0x42   :  { %235 = vmatprep.subr.bf16.mxu0 %v744_v22  ;;  %683 = vmatprep.subr.bf16.mxu1 %v865_v0 }
  0x45   :  { %236 = vmatpush1.bf16.msra.mxu0 %v747_v24  ;;  %684 = vmatpush3.bf16.msra.mxu1 %v748_v26 }
  0x46   :  { %689 = vmatprep.subr.bf16.mxu1 %v865_v0  ;;  %492 = vmatprep.subr.bf16.mxu0 %v751_v28 }
  0x48   :  { %254 = vmatmul.mubr.bf16.vlgmr.msra.gmra.mrb[0].mxu0 %v76_v27  ;;  %686 = vmatmul.mubr.bf16.vlgmr.msra.gmra.mrb[0].mxu1 %v76_v27 }
  0x49   :  { %524 = vmatprep.mubr.bf16.mxu0 %v866_v1  ;;  %705 = vmatprep.mubr.msk.bf16.mxu1 %vm867_vm0, %v865_v0 }
  0x4a   :  { %493 = vmatpush1.bf16.msra.mxu0 %v749_v29  ;;  %690 = vmatpush3.bf16.msra.mxu1 %v752_v30 }
  0x4b   :  { %691 = vmatprep.subr.bf16.mxu1 %v865_v0  ;;  %494 = vmatprep.subr.bf16.mxu0 %v755_v31 }
  0x4e   :  { %495 = vmatpush1.bf16.msra.mxu0 %v753_v32  ;;  %692 = vmatpush3.bf16.msra.mxu1 %v756_v33 }
  0x4f   :  { %693 = vmatprep.subr.bf16.mxu1 %v865_v0  ;;  %496 = vmatprep.subr.bf16.mxu0 %v759_v34 }
  0x52   :  { %497 = vmatpush1.bf16.msra.mxu0 %v757_v35  ;;  %694 = vmatpush3.bf16.msra.mxu1 %v760_v36 }
  0x53   :  { %695 = vmatprep.subr.bf16.mxu1 %v865_v0  ;;  %498 = vmatprep.subr.bf16.mxu0 %v763_v37 }
  0x56   :  { %499 = vmatpush1.bf16.msra.mxu0 %v761_v38  ;;  %696 = vmatpush3.bf16.msra.mxu1 %v764_v39 }
  0x57   :  { %697 = vmatprep.subr.bf16.mxu1 %v865_v0  ;;  %500 = vmatprep.subr.bf16.mxu0 %v767_v40 }
  0x5a   :  { %501 = vmatpush1.bf16.msra.mxu0 %v765_v41  ;;  %698 = vmatpush3.bf16.msra.mxu1 %v768_v42 }
  0x5b   :  { %699 = vmatprep.subr.bf16.mxu1 %v865_v0  ;;  %502 = vmatprep.subr.bf16.mxu0 %v771_v43 }
  0x5e   :  { %503 = vmatpush1.bf16.msra.mxu0 %v769_v44  ;;  %700 = vmatpush3.bf16.msra.mxu1 %v772_v45 }
  0x5f   :  { %701 = vmatprep.subr.bf16.mxu1 %v865_v0  ;;  %504 = vmatprep.subr.bf16.mxu0 %v775_v46 }
  0x62   :  { %505 = vmatpush1.bf16.msra.mxu0 %v773_v47  ;;  %702 = vmatpush3.bf16.msra.mxu1 %v776_v48 }
  0x63   :  { %703 = vmatprep.subr.bf16.mxu1 %v865_v0  ;;  %506 = vmatprep.subr.bf16.mxu0 %v779_v49 }
  0x66   :  { %507 = vmatpush1.bf16.msra.mxu0 %v777_v50  ;;  %704 = vmatpush3.bf16.msra.mxu1 %v780_v51 }
 0x11b   :  { %v255_v61 = vpop.f32.mrb[0].mxu0  ;;  %v296_v2 = vpop.f32.mrb[0].mxu1 }
 0x11c   :  { %v256_v62 = vadd.f32 %v255_v61, %v81_v58  ;;  %v257_v63 = vpop.f32.mrb[1].mxu0  ;;  %v297_v5 = vadd.f32 %v296_v2, %v89_v60  ;;  %v687_v6 = vpop.f32.mrb[1].mxu1 }
 0x11d   :  { %v258_v0 = vadd.f32 %v257_v63, %v85_v59  ;;  %v259_v1 = vpop.f32.mrb[2].mxu0  ;;  %v299_v8 = vpop.f32.mrb[2].mxu1 }
 0x11e   :  { %v624_v3 = vmul.f32 -1.442695, %v256_v62  ;;  %v260_v4 = vpop.f32.mrb[3].mxu0  ;;  %v688_v9 = vpop.f32.mrb[3].mxu1 }
 0x11f   :  { %v308_v7 = vmax.f32 %v258_v0, 0.0 }
 0x120   :  { %781 = vpow2.f32 %v624_v3 }
 0x121   :  { %v309_v10 = vsub.f32 %v308_v7, %v297_v5 }
 0x12a   :  { %v782_v11 = vpop.eup %781 }
 0x12b   :  { %v305_v12 = vadd.f32 1.0, %v782_v11 }
 0x12d   :  { %783 = vrcp.f32 %v305_v12 }
 0x137   :  { %v784_v13 = vpop.eup %783 }
 0x138   :  { %v310_v14 = vmul.f32 %v784_v13, %v309_v10 }
 0x13a   :  { %v311_v15 = vadd.f32 %v310_v14, %v297_v5 }
 0x13c   :  { %v347_v16 = vpack.c.bf16 %v311_v15, %v311_v15 }
 0x13e   :  { %525 = vmatmul.mubr.bf16.vlgmr.msra.gmra.mrb[4].mxu0 %v347_v16  ;;  %706 = vmatmul.mubr.bf16.vlgmr.msra.gmra.mrb[4].mxu1 %v347_v16 }
 0x211   :  { %v526_v20 = vpop.f32.mrb[4].mxu0  ;;  %v567_v22 = vpop.f32.mrb[4].mxu1 }
 0x212   :  { %v527_v23 = vadd.f32 %v526_v20, %v352_v18  ;;  %v528_v24 = vpop.f32.mrb[5].mxu0  ;;  %v707_v25 = vpop.f32.mrb[5].mxu1  ;;  %v568_v32 = vadd.f32 %v567_v22, %v360_v21 }
 0x213   :  { %v529_v26 = vadd.f32 %v528_v24, %v356_v19  ;;  %v530_v27 = vpop.f32.mrb[6].mxu0  ;;  %v570_v28 = vpop.f32.mrb[6].mxu1 }
 0x214   :  { %v650_v29 = vmul.f32 -1.442695, %v527_v23  ;;  %v531_v30 = vpop.f32.mrb[7].mxu0  ;;  %v708_v31 = vpop.f32.mrb[7].mxu1 }
 0x215   :  { %v579_v33 = vmax.f32 %v529_v26, 0.0 }
 0x216   :  { %785 = vpow2.f32 %v650_v29 }
 0x217   :  { %v580_v34 = vsub.f32 %v579_v33, %v568_v32 }
 0x220   :  { %v786_v35 = vpop.eup %785 }
 0x221   :  { %v576_v36 = vadd.f32 1.0, %v786_v35 }
 0x223   :  { %787 = vrcp.f32 %v576_v36 }
 0x22d   :  { %v788_v37 = vpop.eup %787 }
 0x22e   :  { %v581_v38 = vmul.f32 %v788_v37, %v580_v34 }
 0x230   :  { %v582_v39 = vadd.f32 %v581_v38, %v568_v32 }
 0x232   :  { %583 = vst [vmem:[#allocation7] sm:$0xff] %v582_v39 }
 0x233   :  { %844 = shalt.err (!%p841_p6)
}
 0x234   :  { %s845_s17 = scalar_lea.hbm %s961_s3, 128 }
 0x235   :  { %p846_p7 = scmp.ne.s32.totalorder %s961_s3, %s845_s17  ;;  %p849_p8 = scmp.lt.u32.totalorder %s845_s17, %s961_s3 }
 0x237   :  { %p851_p9 = pnand %p849_p8, %p846_p7 }
 0x239   :  { %854 = shalt.err (!%p851_p9)
}
 0x23a   :  { %593 = dma.vmem_to_hbm [thread:$0]  %s591_s13, 128, %s961_s3, [#allocation4]  }
 0x23b   :  { %859 = dma.done.wait [#allocation4], 128  }
 0x23c   :  { %860 = vsyncadd [#allocation4], 4294967168 }
 0x23d   :  { %597 = vsyncpa [#allocation3], 1 }
 0x23e   :  { %598 = vsyncpa [#allocation6], 1 }
 0x23f   :  { %599 = vsyncpa [#allocation4], 1 }

</bundles_post_ra>
